<compile_context>
chip_gen: v7x
topology: tpu7x:2x2x1
jax: 0.10.0
libtpu: 0.0.40
codegen_flags: <defaults>
</compile_context>

<pallas_src>
import functools

import jax
import jax.numpy as jnp
import numpy as np
from jax.experimental import pallas as pl
from jax.experimental.pallas import tpu as pltpu


# ---------------------------------------------------------------------------
# Kernel 1: LayerNorm + fused Q/KV projection (single lane-dense MXU matmul)
# ---------------------------------------------------------------------------
def _ln_qkv_kernel(x_ref, w_ref, q_ref, kv_ref):
    # x_ref:  (1, tn, dim)
    # w_ref:  (dim, inner_dim + 2*dim_head)  bf16   == gamma-folded [Wq*scale|Wk|Wv]
    # q_ref:  (1, tn, inner_dim)   bf16 (token-major, lane-dense)
    # kv_ref: (1, tn, 2*dim_head)  bf16 (k and v fused along lanes)
    x = x_ref[0].astype(jnp.float32)                      # (tn, dim)

    # LayerNorm (beta buffer == 0; gamma folded into w) in f32
    mu = jnp.mean(x, axis=-1, keepdims=True)
    var = jnp.mean(jnp.square(x - mu), axis=-1, keepdims=True)
    xn = ((x - mu) * jax.lax.rsqrt(var + 1e-5)).astype(jnp.bfloat16)

    # One fused projection: bf16 operands, f32 accumulation on the MXU
    res = jnp.dot(xn, w_ref[...], preferred_element_type=jnp.float32)

    inner_dim = q_ref.shape[-1]
    q_ref[0] = res[:, :inner_dim].astype(q_ref.dtype)
    kv_ref[0] = res[:, inner_dim:].astype(kv_ref.dtype)


# ---------------------------------------------------------------------------
# Kernel 2: flash-style attention (online softmax, heads collapsed into M)
#            + fused output projection
# ---------------------------------------------------------------------------
def _flash_attn_kernel(q_ref, kv_ref, wo_ref, o_ref,
                       q_s, m_s, l_s, acc_s, *, heads, dim_head, kv_tile):
    # q_ref:  (1, tq, heads*dim_head)  bf16 (token-major, softmax scale pre-folded)
    # kv_ref: (1, KVB, 2*dim_head)     bf16; KVB == n (resident) or kv_tile (streamed)
    # wo_ref: (heads*dim_head, dim)    bf16
    # o_ref:  (1, tq, dim)
    # scratch: q_s (heads*tq, d) bf16, m_s/l_s (heads*tq, 1) f32, acc_s (heads*tq, d) f32
    ki = pl.program_id(2)
    tq = q_ref.shape[1]

    @pl.when(ki == 0)
    def _init():
        # Repack q to head-collapsed (heads*tq, d) ONCE per q tile.
        q_tok = q_ref[0]                                   # (tq, heads*d)
        for h in range(heads):
            q_s[pl.ds(h * tq, tq), :] = q_tok[:, h * dim_head:(h + 1) * dim_head]
        m_s[...] = jnp.full_like(m_s, -1e30)
        l_s[...] = jnp.zeros_like(l_s)
        acc_s[...] = jnp.zeros_like(acc_s)

    # Select the current kv tile (resident K/V: dynamic slice; streamed: whole block).
    if kv_ref.shape[1] != kv_tile:
        off = pl.multiple_of(ki * kv_tile, kv_tile)
    else:
        off = 0
    kv = kv_ref[0, pl.ds(off, kv_tile), :]                 # (tk, 2*d) bf16
    k = kv[:, :dim_head]                                   # (tk, d)
    v = kv[:, dim_head:]                                   # (tk, d)

    # Scores for ALL heads in one 2-D matmul: (heads*tq, d) x (tk, d)^T, f32 acc
    s = jax.lax.dot_general(q_s[...], k, (((1,), (1,)), ((), ())),
                            preferred_element_type=jnp.float32)   # (heads*tq, tk)

    # online softmax update (f32)
    m_prev = m_s[...]
    m_new = jnp.maximum(m_prev, jnp.max(s, axis=-1, keepdims=True))
    alpha = jnp.exp(m_prev - m_new)
    p = jnp.exp(s - m_new)
    l_s[...] = alpha * l_s[...] + jnp.sum(p, axis=-1, keepdims=True)
    acc_s[...] = alpha * acc_s[...] + jnp.dot(
        p.astype(jnp.bfloat16), v, preferred_element_type=jnp.float32)
    m_s[...] = m_new

    @pl.when(ki == pl.num_programs(2) - 1)
    def _finalize():
        inv_l = pl.reciprocal(l_s[...], approx=True)              # (heads*tq, 1)
        o_hc = (acc_s[...] * inv_l).astype(jnp.bfloat16)          # (heads*tq, d)
        # re-interleave heads along lanes -> (tq, heads*d), then ONE projection
        o_tok = jnp.concatenate(
            [o_hc[h * tq:(h + 1) * tq, :] for h in range(heads)], axis=-1)
        o_ref[0] = jnp.dot(o_tok, wo_ref[...],
                           preferred_element_type=jnp.float32).astype(o_ref.dtype)


# ---------------------------------------------------------------------------
# Wrapper
# ---------------------------------------------------------------------------
def _pick_tile(n, cap):
    """Largest tile <= cap dividing n; prefer 128-multiples, then 8-multiples.
    Never returns tiny arbitrary divisors; falls back to the full extent
    (a full-extent block is always a legal BlockSpec)."""
    if n <= cap:
        return n
    best8 = None
    for t in range(cap, 0, -1):
        if n % t:
            continue
        if t % 128 == 0:
            return t
        if best8 is None and t % 8 == 0:
            best8 = t
    return best8 if best8 is not None else n


def attention_forward(x, wq, wkv, wo, *, heads, dim_head, gamma=None):
    b, n, dim = x.shape
    inner_dim = heads * dim_head
    total = inner_dim + 2 * dim_head
    scale = dim_head ** -0.5

    # Host-side weight prep (free layout plumbing):
    #  * softmax scale folded into Wq
    #  * LayerNorm gamma folded into the fused weight (beta buffer is always 0)
    #  * single fused (dim, inner_dim + 2*dim_head) bf16 matrix
    g = jnp.ones((dim,), jnp.float32) if gamma is None else gamma.astype(jnp.float32)
    w_fused = jnp.concatenate([wq.astype(jnp.float32) * scale,
                               wkv.astype(jnp.float32)], axis=1)
    w_fused = (g[:, None] * w_fused).astype(jnp.bfloat16)
    wo_b = wo.astype(jnp.bfloat16)                          # (inner_dim, dim)

    tn = _pick_tile(n, 512)     # projection seq tile
    tq = _pick_tile(n, 256)     # flash query tile (effective MXU M = heads*tq)
    tk = _pick_tile(n, 512)     # flash kv tile

    # ---- kernel 1: LayerNorm + fused QKV projection ----
    q, kv = pl.pallas_call(
        _ln_qkv_kernel,
        out_shape=(
            jax.ShapeDtypeStruct((b, n, inner_dim), jnp.bfloat16),
            jax.ShapeDtypeStruct((b, n, 2 * dim_head), jnp.bfloat16),
        ),
        grid_spec=pltpu.PrefetchScalarGridSpec(
            num_scalar_prefetch=0,
            grid=(b, n // tn),
            in_specs=[
                pl.BlockSpec((1, tn, dim), lambda bi, i: (bi, i, 0)),
                pl.BlockSpec((dim, total), lambda bi, i: (0, 0)),
            ],
            out_specs=[
                pl.BlockSpec((1, tn, inner_dim), lambda bi, i: (bi, i, 0)),
                pl.BlockSpec((1, tn, 2 * dim_head), lambda bi, i: (bi, i, 0)),
            ],
        ),
        compiler_params=pltpu.CompilerParams(
            dimension_semantics=("parallel", "parallel"),
            vmem_limit_bytes=32 * 1024 * 1024),
    )(x, w_fused)

    # Keep the whole K/V sequence of a batch resident in VMEM when it is small
    # (MQA -> tiny); otherwise stream kv tiles from HBM per grid step.
    kv_bytes_per_buf = n * 2 * dim_head * 2
    kv_resident = kv_bytes_per_buf <= 4 * 1024 * 1024
    if kv_resident:
        kv_block = n
        kv_index = lambda bi, qi, ki: (bi, 0, 0)
    else:
        kv_block = tk
        kv_index = lambda bi, qi, ki: (bi, ki, 0)

    # ---- kernel 2: flash attention (heads collapsed) + output projection ----
    kernel = functools.partial(_flash_attn_kernel,
                               heads=heads, dim_head=dim_head, kv_tile=tk)
    out = pl.pallas_call(
        kernel,
        out_shape=jax.ShapeDtypeStruct((b, n, dim), x.dtype),
        grid_spec=pltpu.PrefetchScalarGridSpec(
            num_scalar_prefetch=0,
            grid=(b, n // tq, n // tk),
            in_specs=[
                pl.BlockSpec((1, tq, inner_dim), lambda bi, qi, ki: (bi, qi, 0)),
                pl.BlockSpec((1, kv_block, 2 * dim_head), kv_index),
                pl.BlockSpec((inner_dim, dim), lambda bi, qi, ki: (0, 0)),
            ],
            out_specs=pl.BlockSpec((1, tq, dim), lambda bi, qi, ki: (bi, qi, 0)),
            scratch_shapes=[
                pltpu.VMEM((heads * tq, dim_head), jnp.bfloat16),   # q (head-collapsed)
                pltpu.VMEM((heads * tq, 1), jnp.float32),           # m
                pltpu.VMEM((heads * tq, 1), jnp.float32),           # l
                pltpu.VMEM((heads * tq, dim_head), jnp.float32),    # acc
            ],
        ),
        compiler_params=pltpu.CompilerParams(
            dimension_semantics=("parallel", "parallel", "arbitrary"),
            vmem_limit_bytes=32 * 1024 * 1024),
    )(q, kv, wo_b)
    return out


# ---------------------------------------------------------------------------
# Pure-JAX reference mirroring the PyTorch forward (eval mode, f32)
# ---------------------------------------------------------------------------
def _reference(x, wq, wkv, wo, *, heads, dim_head):
    x32 = x.astype(jnp.float32)
    mu = jnp.mean(x32, axis=-1, keepdims=True)
    var = jnp.mean((x32 - mu) ** 2, axis=-1, keepdims=True)
    xn = (x32 - mu) / jnp.sqrt(var + 1e-5)
    q = xn @ wq                                     # (b, n, h*d)
    kv = xn @ wkv
    k, v = kv[..., :dim_head], kv[..., dim_head:]   # (b, n, d)
    b, n, _ = x.shape
    q = q.reshape(b, n, heads, dim_head).transpose(0, 2, 1, 3)  # (b, h, n, d)
    sim = jnp.einsum('bhid,bjd->bhij', q, k) * dim_head ** -0.5
    attn = jax.nn.softmax(sim, axis=-1)
    out = jnp.einsum('bhij,bjd->bhid', attn, v)
    out = out.transpose(0, 2, 1, 3).reshape(b, n, heads * dim_head)
    return out @ wo


if __name__ == "__main__":
    # small config consistent with the module's constructor
    batch, seq, dim = 2, 8, 32
    heads, dim_head = 4, 16
    inner_dim = heads * dim_head

    key = jax.random.PRNGKey(0)
    kx, kq, kkv, ko = jax.random.split(key, 4)

    x = jax.random.normal(kx, (batch, seq, dim), dtype=jnp.float32)
    # Linear weights stored as (in, out) == W.T of PyTorch's (out, in)
    wq = jax.random.normal(kq, (dim, inner_dim), dtype=jnp.float32) * 0.05
    wkv = jax.random.normal(kkv, (dim, 2 * dim_head), dtype=jnp.float32) * 0.05
    wo = jax.random.normal(ko, (inner_dim, dim), dtype=jnp.float32) * 0.05

    out = attention_forward(x, wq, wkv, wo, heads=heads, dim_head=dim_head)
    out = jax.block_until_ready(out)

    ref = _reference(x, wq, wkv, wo, heads=heads, dim_head=dim_head)
    # bf16 MXU operands (f32 accumulate) loosen agreement vs the f32 reference
    np.testing.assert_allclose(np.asarray(out), np.asarray(ref),
                               rtol=2e-2, atol=2e-2)

    print("KERNEL_OK")
</pallas_src>

<mosaic_0001>
module attributes {stable_mosaic.version = 11 : i64} {
  func.func @_ln_qkv_kernel(%arg0: i32, %arg1: i32, %arg2: memref<1x8x32xf32, #tpu.memory_space<vmem>>, %arg3: memref<32x96xbf16, #tpu.memory_space<vmem>>, %arg4: memref<1x8x64xbf16, #tpu.memory_space<vmem>>, %arg5: memref<1x8x32xbf16, #tpu.memory_space<vmem>>) attributes {dimension_semantics = [#tpu.dimension_semantics<parallel>, #tpu.dimension_semantics<parallel>], iteration_bounds = array<i64: 2, 1>, scalar_prefetch = 0 : i64, scratch_operands = 0 : i64, tpu.core_type = #tpu.core_type<tc>, window_params = [{transform_indices = @transform_0, window_bounds = array<i64: 1, 8, 32>}, {pipeline_mode = #tpu.pipeline_mode<synchronous>, transform_indices = @transform_1, window_bounds = array<i64: 32, 96>}, {transform_indices = @transform_2, window_bounds = array<i64: 1, 8, 64>}, {transform_indices = @transform_3, window_bounds = array<i64: 1, 8, 32>}]} {
    %c0 = arith.constant 0 : index
    %c0_0 = arith.constant 0 : index
    %c0_1 = arith.constant 0 : index
    %0 = vector.load %arg2[%c0, %c0_0, %c0_1] : memref<1x8x32xf32, #tpu.memory_space<vmem>>, vector<1x8x32xf32>
    %1 = vector.shape_cast %0 : vector<1x8x32xf32> to vector<8x32xf32>
    %cst = arith.constant dense<0.000000e+00> : vector<8xf32>
    %2 = vector.multi_reduction <add>, %1, %cst [1] : vector<8x32xf32> to vector<8xf32>
    %3 = vector.shape_cast %2 : vector<8xf32> to vector<8x1xf32>
    %cst_2 = arith.constant 3.200000e+01 : f32
    %4 = vector.broadcast %cst_2 : f32 to vector<8x1xf32>
    %5 = arith.divf %3, %4 : vector<8x1xf32>
    %6 = vector.broadcast %5 : vector<8x1xf32> to vector<8x32xf32>
    %7 = arith.subf %1, %6 : vector<8x32xf32>
    %8 = arith.mulf %7, %7 : vector<8x32xf32>
    %cst_3 = arith.constant dense<0.000000e+00> : vector<8xf32>
    %9 = vector.multi_reduction <add>, %8, %cst_3 [1] : vector<8x32xf32> to vector<8xf32>
    %10 = vector.shape_cast %9 : vector<8xf32> to vector<8x1xf32>
    %cst_4 = arith.constant 3.200000e+01 : f32
    %11 = vector.broadcast %cst_4 : f32 to vector<8x1xf32>
    %12 = arith.divf %10, %11 : vector<8x1xf32>
    %13 = vector.broadcast %5 : vector<8x1xf32> to vector<8x32xf32>
    %14 = arith.subf %1, %13 : vector<8x32xf32>
    %cst_5 = arith.constant 9.99999974E-6 : f32
    %15 = vector.broadcast %cst_5 : f32 to vector<8x1xf32>
    %16 = arith.addf %12, %15 : vector<8x1xf32>
    %17 = math.rsqrt %16 : vector<8x1xf32>
    %18 = vector.broadcast %17 : vector<8x1xf32> to vector<8x32xf32>
    %19 = arith.mulf %14, %18 : vector<8x32xf32>
    %20 = arith.truncf %19 : vector<8x32xf32> to vector<8x32xbf16>
    %c0_6 = arith.constant 0 : index
    %c0_7 = arith.constant 0 : index
    %21 = vector.load %arg3[%c0_6, %c0_7] : memref<32x96xbf16, #tpu.memory_space<vmem>>, vector<32x96xbf16>
    %cst_8 = arith.constant dense<0.000000e+00> : vector<8x96xf32>
    %22 = tpu.matmul %20, %21, %cst_8 {dimension_numbers = #tpu.dot_dimension_numbers<[1], [0], [0], [1], [0, 0, 1, 1], [], []>} : vector<8x32xbf16>, vector<32x96xbf16>, vector<8x96xf32> -> vector<8x96xf32>
    %23 = vector.extract_strided_slice %22 {offsets = [0, 0], sizes = [8, 64], strides = [1, 1]} : vector<8x96xf32> to vector<8x64xf32>
    %24 = arith.truncf %23 : vector<8x64xf32> to vector<8x64xbf16>
    %c0_9 = arith.constant 0 : index
    %c0_10 = arith.constant 0 : index
    %c0_11 = arith.constant 0 : index
    %25 = vector.load %arg4[%c0_9, %c0_10, %c0_11] : memref<1x8x64xbf16, #tpu.memory_space<vmem>>, vector<1x8x64xbf16>
    %26 = vector.shape_cast %25 : vector<1x8x64xbf16> to vector<8x64xbf16>
    %27 = vector.shape_cast %24 : vector<8x64xbf16> to vector<1x8x64xbf16>
    tpu.vector_store %arg4[%c0_9, %c0_10, %c0_11], %27 {strides = array<i32>} : memref<1x8x64xbf16, #tpu.memory_space<vmem>>, vector<1x8x64xbf16>,
    %28 = vector.extract_strided_slice %22 {offsets = [0, 64], sizes = [8, 32], strides = [1, 1]} : vector<8x96xf32> to vector<8x32xf32>
    %29 = arith.truncf %28 : vector<8x32xf32> to vector<8x32xbf16>
    %c0_12 = arith.constant 0 : index
    %c0_13 = arith.constant 0 : index
    %c0_14 = arith.constant 0 : index
    %30 = vector.load %arg5[%c0_12, %c0_13, %c0_14] : memref<1x8x32xbf16, #tpu.memory_space<vmem>>, vector<1x8x32xbf16>
    %31 = vector.shape_cast %30 : vector<1x8x32xbf16> to vector<8x32xbf16>
    %32 = vector.shape_cast %29 : vector<8x32xbf16> to vector<1x8x32xbf16>
    tpu.vector_store %arg5[%c0_12, %c0_13, %c0_14], %32 {strides = array<i32>} : memref<1x8x32xbf16, #tpu.memory_space<vmem>>, vector<1x8x32xbf16>,
    return
  }
  func.func @transform_0(%arg0: i32, %arg1: i32) -> (i32, i32, i32) {
    %c0_i32 = arith.constant 0 : i32
    %c0_i32_0 = arith.constant 0 : i32
    return %arg0, %arg1, %c0_i32 : i32, i32, i32
  }
  func.func @transform_1(%arg0: i32, %arg1: i32) -> (i32, i32) {
    %c0_i32 = arith.constant 0 : i32
    %c0_i32_0 = arith.constant 0 : i32
    %c0_i32_1 = arith.constant 0 : i32
    return %c0_i32, %c0_i32_0 : i32, i32
  }
  func.func @transform_2(%arg0: i32, %arg1: i32) -> (i32, i32, i32) {
    %c0_i32 = arith.constant 0 : i32
    %c0_i32_0 = arith.constant 0 : i32
    return %arg0, %arg1, %c0_i32 : i32, i32, i32
  }
  func.func @transform_3(%arg0: i32, %arg1: i32) -> (i32, i32, i32) {
    %c0_i32 = arith.constant 0 : i32
    %c0_i32_0 = arith.constant 0 : i32
    return %arg0, %arg1, %c0_i32 : i32, i32, i32
  }
}

</mosaic_0001>

<bundles_post_ra>
// kernel: tpu_custom_call.1
= control target key start
LH: loop header
LB: loop body
LE: loop exit
PB: predicated region body
PF: predicated region fallthrough
CT: control target
= control target key end

     0   :  { %9 = vsyncpa [#allocation3], 0  ;;  %s1059_s0 = inlined_call_operand.hbm [shape: f32[2,8,32], index: 0, kind: input, shape index: {}]   ;;  %s1060_s1 = inlined_call_operand.hbm [shape: bf16[32,96], index: 1, kind: input, shape index: {}]   ;;  %s1061_s2 = inlined_call_operand.hbm [shape: bf16[2,8,64], index: 2, kind: output, shape index: {0}]   ;;  %s1062_s3 = inlined_call_operand.hbm [shape: bf16[2,8,32], index: 3, kind: output, shape index: {1}]  }
   0x1   :  { %11 = vsyncpa [#allocation3 + $0x1], 0 }
   0x2   :  { %12 = vsyncpa [#allocation6], 0 }
   0x3   :  { %13 = vsyncpa [#allocation4], 0 }
   0x4   :  { %15 = vsyncpa [#allocation4 + $0x1], 0 }
   0x5   :  { %16 = vsyncpa [#allocation9], 0 }
   0x6   :  { %18 = vsyncpa [#allocation9 + $0x1], 0  ;;  %s804_s12 = smov 0   ;;  %s806_s13 = smov 0  }
   0x7   :  { %s808_s14 = smov 0   ;;  %s810_s15 = smov 0  }
   0x8   :  { %s812_s16 = smov 0   ;;  %s814_s17 = smov 0  }
   0x9 LB: > { %s476_s18 = sadd.s32 4294967295, %s773_s17   ;;  %s477_s19 = sadd.s32 4294967294, %s773_s17   ;;  %s773_s17 = sphi %s814_s17, %s24_s17   ;;  %s769_s16 = sphi %s812_s16, %s1086_s16   ;;  %s765_s15 = sphi %s810_s15, %s1085_s15   ;;  %s761_s14 = sphi %s808_s14, %s1084_s14   ;;  %s757_s13 = sphi %s806_s13, %s1083_s13   ;;  %s753_s12 = sphi %s804_s12, %s1082_s12  }
   0xa   : > { %p58_p0 = scmp.ne.s32.totalorder %s757_s13, %s753_s12  ;;  %p838_p1 = scmp.eq.s32.totalorder %s476_s18, 0 }
   0xb   : > { %p842_p2 = scmp.eq.s32.totalorder %s476_s18, 1  ;;  %p111_p3 = scmp.eq.s32.totalorder %s477_s19, 1 }
   0xc   : > { %s1067_s20 = scalar_select %p838_p1, 1, 0 }
   0xd   : > { %s1068_s21 = scalar_select %p842_p2, 1, 0 }
   0xe   : > { %p848_p4 = por %p838_p1, %p58_p0  ;;  %p478_p5 = scmp.ge.s32.totalorder %s773_s17, 1 }
   0xf   : > { %p853_p6 = por %p111_p3, %p58_p0  ;;  %p146_p7 = scmp.lt.s32.totalorder %s773_s17, 3 }
  0x10   : > { %s1069_s22 = scalar_select %p848_p4, 1, 0 }
  0x11   : > { %s1070_s23 = scalar_select %p853_p6, 1, 0 }
  0x12   : > { %p858_p8 = pnand %p478_p5, %p146_p7  ;;  %s775_s25 = smov [#allocation5]  }
  0x13   : > { %s158_s26 = sshll.u32 %s775_s25, 4  ;;  %s36_s28 = sadd.s32 1, %s769_s16  ;;  %s159_s26 = int_to_ptr.vmem [resolvable:$true] %s158_s26 }
  0x14   : > { %s1071_s24 = scalar_select %p858_p8, 1, 0 }
  0x15   : > { %p520_p9 = pneg %p858_p8  ;;  %s597_s4 = scalar_lea.hbm %s1060_s1, 256 }
  0x16   : > { %p598_p12 = scmp.ne.s32.totalorder %s1060_s1, %s597_s4  ;;  %p604_p5 = scmp.lt.u32.totalorder %s597_s4, %s1060_s1 }
  0x17   : > { %p867_p11 = pnand %p520_p9, %p838_p1 }
  0x19   : > { %p599_p13 = pneg %p867_p11 }
  0x1b   : > { %p600_p0 = pnand %p599_p13, %p598_p12 }
  0x1d   : > { %p601_p3 = pneg %p600_p0 }
  0x1f   : > { %p606_p7 = pnand %p604_p5, %p601_p3 }
  0x21   : > { %609 = shalt.err (!%p606_p7)
}
  0x22   : > { %s610_s9 = scalar_lea.vmem %s159_s26, 256  ;;  %p618_p1 = scmp.lt.s32.totalorder %s159_s26, %s159_s26 }
  0x23   : > { %p611_p9 = scmp.ne.s32.totalorder %s159_s26, %s610_s9  ;;  %p619_p4 = scmp.lt.s32.totalorder %s610_s9, %s610_s9 }
  0x25   : > { %p613_p10 = pnand %p611_p9, %p599_p13  ;;  %p620_p8 = por %p619_p4, %p618_p1 }
  0x27   : > { %p614_p6 = pneg %p613_p10 }
  0x29   : > { %p621_p2 = pnand %p620_p8, %p614_p6 }
  0x2b   : > { %624 = shalt.err (!%p621_p2)
}
  0x2c   : > { %s776_s10 = smov 64   ;;  %s777_s11 = smov 4  }
  0x2d   : > { %523 = dma.hbm_to_vmem [thread:$0]  (!%p867_p11), %s1060_s1, 256, %s159_s26, [#allocation6], %s776_s10, %s776_s10, %s777_s11  }
  0x2e   : > { %p38_p1 = scmp.ge.s32.totalorder %s36_s28, 2  ;;  %s45_s25 = sadd.s32 1, %s761_s14 }
  0x2f   : > { %p52_p2 = scmp.ne.s32.totalorder %s761_s14, %s757_s13  ;;  %p53_p4 = scmp.eq.s32.totalorder %s773_s17, 0 }
  0x30   : > { %s1088_s28 = smov (%p38_p1, %s36_s28), 0  ;;  %p1074_p8 = scmp.ne.s32.totalorder %s1068_s21, 0 }
  0x31   : > { %p894_p6 = por %p53_p4, %p52_p2  ;;  %s40_s27 = ssub.s32 %s769_s16, %s1088_s28 }
  0x32   : > { %p900_p10 = por %p1074_p8, %p52_p2  ;;  %p536_p12 = scmp.lt.s32.totalorder %s773_s17, 2 }
  0x33   : > { %p43_p11 = scmp.eq.s32.totalorder %s40_s27, 0  ;;  %s172_s26 = sand.u32 1, %s761_s14  }
  0x34   : > { %s481_s4 = sshll.u32 %s172_s26, 3  ;;  %s482_s6 = sshll.u32 %s769_s16, 7 }
  0x35   : > { %s909_s5 = scalar_select %p43_p11, %s761_s14, %s45_s25  }
  0x36   : > { %s915_s9 = scalar_lea.hbm %s1059_s0, %s482_s6  ;;  %s176_s21 = scalar_lea.vmem [#allocation2], %s481_s4 }
  0x37   : > { %s184_s10 = sshll.u32 %s176_s21, 4  ;;  %p921_p13 = pnand %p536_p12, %p894_p6  ;;  %s917_s10 = int_to_ptr.vmem [resolvable:$true] %s184_s10 }
  0x38   : > { %s173_s18 = scalar_lea.sflag [#allocation3], %s172_s26  ;;  %s625_s19 = scalar_lea.hbm %s915_s9, 128 }
  0x39   : > { %p626_p0 = scmp.ne.s32.totalorder %s915_s9, %s625_s19  ;;  %p627_p3 = pneg %p921_p13 }
  0x3a   : > { %s630_s4 = scalar_lea.hbm %s1059_s0, 256  ;;  %p631_p9 = scmp.lt.u32.totalorder %s915_s9, %s1059_s0 }
  0x3b   : > { %p628_p5 = pnand %p627_p3, %p626_p0  ;;  %p632_p1 = scmp.lt.u32.totalorder %s630_s4, %s625_s19 }
  0x3c   : > { %p634_p4 = scmp.lt.u32.totalorder %s625_s19, %s915_s9 }
  0x3d   : > { %p629_p7 = pneg %p628_p5  ;;  %p633_p2 = por %p632_p1, %p631_p9 }
  0x3f   : > { %p635_p6 = por %p634_p4, %p633_p2 }
  0x41   : > { %p636_p8 = pnand %p635_p6, %p629_p7 }
  0x43   : > { %639 = shalt.err (!%p636_p8)
}
  0x44   : > { %s640_s26 = scalar_lea.vmem %s917_s10, 128  ;;  %s778_s7 = smov [#allocation2]  }
  0x45   : > { %p641_p12 = scmp.ne.s32.totalorder %s917_s10, %s640_s26  ;;  %s645_s8 = sshll.u32 %s778_s7, 4  ;;  %s646_s8 = int_to_ptr.vmem [resolvable:$false] %s645_s8 }
  0x46   : > { %s647_s21 = scalar_lea.vmem %s646_s8, 256  ;;  %p648_p5 = scmp.lt.s32.totalorder %s917_s10, %s646_s8 }
  0x47   : > { %p643_p11 = pnand %p641_p12, %p627_p3  ;;  %p649_p9 = scmp.lt.s32.totalorder %s647_s21, %s640_s26 }
  0x49   : > { %p644_p0 = pneg %p643_p11  ;;  %p650_p1 = por %p649_p9, %p648_p5 }
  0x4b   : > { %p651_p2 = pnand %p650_p1, %p644_p0 }
  0x4d   : > { %654 = shalt.err (!%p651_p2)
}
  0x4e   : > { %527 = dma.hbm_to_vmem [thread:$0]  (!%p921_p13), %s915_s9, 128, %s917_s10, %s173_s18  }
  0x4f   : > { %p1077_p7 = scmp.ne.s32.totalorder %s1071_s24, 0 }
  0x50   : > { %s953_s19 = sand.u32 (!%p1077_p7), 1, %s757_s13   ;;  %p1078_p3 = scmp.ne.s32.totalorder (!%p1077_p7), %s1069_s22, 0 }
  0x51   : > { %193 = sbr.rel (%p1077_p7) target bundleno = 747 (0x2eb), region = 28  ;;  %s484_s25 = sshll.u32 (!%p1077_p7), %s953_s19, 3 }
  0x52   : > { %s196_s27 = scalar_lea.sflag (!%p1077_p7), [#allocation3], %s953_s19  ;;  %s199_s4 = scalar_lea.vmem (!%p1077_p7), [#allocation2], %s484_s25 }
  0x58   : > { %736 = dma.done.wait (%p1078_p3), %s196_s27, 128  }
  0x59   : > { %738 = vsyncadd (%p1078_p3), %s196_s27, 4294967168  ;;  %p1079_p4 = scmp.ne.s32.totalorder %s1067_s20, 0 }
  0x5b   : > { %740 = dma.done.wait (%p1079_p4), [#allocation6], 256  }
  0x5c   : > { %742 = vsyncadd (%p1079_p4), [#allocation6], 4294967040  ;;  %vm233_vm0 = vcmask 261120   ;;  %v232_v0 = vld [vmem:[%s199_s4] sm:$0xff]  ;;  %v593_v7 = vld [vmem:[#allocation5] sm:$0xff]   ;;  %v779_v8 = vmov 0.0  }
  0x5d   : > { %v234_v1 = vsel %vm233_vm0, %v232_v0, 0.0  ;;  %502 = vmatprep.subr.bf16.mxu0 %v779_v8  ;;  %vm780_vm1 = vmmov 0   ;;  %v594_v9 = vld [vmem:[#allocation5 + $0x8] sm:$0xff]   ;;  %s486_s20 = sshll.u32 %s953_s19, 2  ;;  %s494_s22 = sshll.u32 %s765_s15, 6  ;;  %vm309_vm2 = vcmask 519168  }
  0x5e   : > { %235 = vadd.xlane.f32.xlu0 %v234_v1  ;;  %506 = vmatprep.mubr.msk.bf16.mxu0 %vm780_vm1, %v779_v8  ;;  %s223_s24 = scalar_lea.vmem [#allocation7], %s486_s20  ;;  %s977_s18 = scalar_lea.hbm %s1061_s2, %s494_s22 }
  0x5f   : > { %503 = vmatpush3.bf16.msra.mxu0 %v593_v7  ;;  %s339_s9 = sshll.u32 %s223_s24, 4  ;;  %s781_s29 = smov 64   ;;  %s979_s9 = int_to_ptr.vmem [resolvable:$true] %s339_s9 }
  0x60   : > { %504 = vmatprep.subr.bf16.mxu0 %v779_v8  ;;  %s320_s6 = scalar_lea.sflag [#allocation4], %s953_s19  ;;  %s655_s26 = scalar_lea.vmem %s979_s9, 64 }
  0x61   : > { %p656_p13 = scmp.ne.s32.totalorder %s979_s9, %s655_s26  ;;  %s782_s7 = smov [#allocation7]  }
  0x62   : > { %s659_s8 = sshll.u32 %s782_s7, 4  ;;  %s660_s8 = int_to_ptr.vmem [resolvable:$false] %s659_s8 }
  0x63   : > { %505 = vmatpush3.bf16.msra.mxu0 %v594_v9  ;;  %p657_p6 = pnand %p656_p13, %p900_p10  ;;  %s661_s21 = scalar_lea.vmem %s660_s8, 128 }
  0x64   : > { %p662_p12 = scmp.lt.s32.totalorder %s979_s9, %s660_s8  ;;  %p663_p11 = scmp.lt.s32.totalorder %s661_s21, %s655_s26 }
  0x65   : > { %p658_p8 = pneg %p657_p6 }
  0x66   : > { %p664_p0 = por %p663_p11, %p662_p12 }
  0x68   : > { %p665_p5 = pnand %p664_p0, %p658_p8 }
  0xeb   : > { %v236_v2 = vpop.xlane.xlu0 %235 }
  0xec   : > { %v238_v3 = vmul.f32 0.03125, %v236_v2 }
  0xee   : > { %v239_v4 = vsub.f32 %v232_v0, %v238_v3 }
  0xf0   : > { %v240_v5 = vmul.f32 %v239_v4, %v239_v4 }
  0xf2   : > { %v241_v6 = vsel %vm233_vm0, %v240_v5, 0.0 }
  0xf3   : > { %242 = vadd.xlane.f32.xlu0 %v241_v6 }
 0x180   : > { %v243_v10 = vpop.xlane.xlu0 %242 }
 0x181   : > { %v244_v11 = vmul.f32 0.03125, %v243_v10 }
 0x183   : > { %v245_v12 = vadd.f32 1e-05, %v244_v11 }
 0x185   : > { %595 = vrsqrt.f32 %v245_v12 }
 0x18f   : > { %v596_v13 = vpop.eup %595 }
 0x190   : > { %v247_v14 = vmul.f32 %v596_v13, %v239_v4 }
 0x192   : > { %v248_v15 = vpack.c.bf16 %v247_v14, %v247_v14 }
 0x194   : > { %507 = vmatmul.mubr.msk.bf16.vlgmr.msra.gmra.mrb[0].mxu0 %vm233_vm0, %v248_v15 }
 0x267   : > { %v302_v16 = vpop.f32.mrb[0].mxu0 }
 0x268   : > { %v308_v17 = vpack.c.bf16 %v302_v16, %v302_v16  ;;  %v508_v18 = vpop.f32.mrb[1].mxu0 }
 0x269   : > { %v305_v19 = vpop.f32.mrb[2].mxu0 }
 0x26a   : > { %314 = vrot.lane.b32.xlu1 %v308_v17, %s781_s29  ;;  %v509_v20 = vpop.f32.mrb[3].mxu0  ;;  %310 = vst.msk [vmem:[%s223_s24] sm:$0xf] %vm309_vm2, %v308_v17 }
 0x26b   : > { %668 = shalt.err (!%p665_p5)
}
 0x26c   : > { %s669_s25 = scalar_lea.hbm %s977_s18, 64  ;;  %s673_s24 = scalar_lea.hbm %s1061_s2, 128 }
 0x26d   : > { %p670_p9 = scmp.ne.s32.totalorder %s977_s18, %s669_s25  ;;  %p674_p7 = scmp.lt.u32.totalorder %s977_s18, %s1061_s2 }
 0x26e   : > { %p675_p3 = scmp.lt.u32.totalorder %s673_s24, %s669_s25  ;;  %p677_p13 = scmp.lt.u32.totalorder %s669_s25, %s977_s18 }
 0x26f   : > { %p671_p1 = pnand %p670_p9, %p900_p10 }
 0x270   : > { %p676_p4 = por %p675_p3, %p674_p7 }
 0x271   : > { %p672_p2 = pneg %p671_p1 }
 0x272   : > { %p678_p6 = por %p677_p13, %p676_p4 }
 0x274   : > { %p679_p8 = pnand %p678_p6, %p672_p2 }
 0x276   : > { %682 = shalt.err (!%p679_p8)
}
 0x277   : > { %516 = dma.vmem_to_hbm [thread:$0]  (%p900_p10), %s979_s9, 64, %s977_s18, %s320_s6   ;;  %vm317_vm3 = vcmask 257024  }
 0x278   : > { %s230_s29 = scalar_lea.vmem [#allocation8], %s486_s20  ;;  %s1010_s21 = scalar_lea.hbm %s1062_s3, %s494_s22 }
 0x279   : > { %s353_s26 = sshll.u32 %s230_s29, 4  ;;  %s325_s25 = scalar_lea.sflag [#allocation9], %s953_s19  ;;  %s1012_s26 = int_to_ptr.vmem [resolvable:$true] %s353_s26 }
 0x27a   : > { %s683_s27 = scalar_lea.vmem %s1012_s26, 64  ;;  %s783_s20 = smov [#allocation8]  }
 0x27b   : > { %p684_p12 = scmp.ne.s32.totalorder %s1012_s26, %s683_s27  ;;  %s687_s15 = sshll.u32 %s783_s20, 4  ;;  %s688_s15 = int_to_ptr.vmem [resolvable:$false] %s687_s15 }
 0x27c   : > { %s689_s9 = scalar_lea.vmem %s688_s15, 128  ;;  %p690_p5 = scmp.lt.s32.totalorder %s1012_s26, %s688_s15 }
 0x27d   : > { %p685_p11 = pnand %p684_p12, %p900_p10  ;;  %p691_p9 = scmp.lt.s32.totalorder %s689_s9, %s683_s27 }
 0x27f   : > { %p686_p0 = pneg %p685_p11  ;;  %p692_p1 = por %p691_p9, %p690_p5 }
 0x281   : > { %p693_p2 = pnand %p692_p1, %p686_p0 }
 0x2dc   : > { %v315_v21 = vpop.permute.xlu1 %314 }
 0x2dd   : > { %318 = vst.msk [vmem:[%s230_s29] sm:$0xf] %vm317_vm3, %v315_v21 }
 0x2de   : > { %696 = shalt.err (!%p693_p2)
}
 0x2df   : > { %s697_s19 = scalar_lea.hbm %s1010_s21, 64  ;;  %s701_s6 = scalar_lea.hbm %s1062_s3, 128 }
 0x2e0   : > { %p698_p7 = scmp.ne.s32.totalorder %s1010_s21, %s697_s19  ;;  %p702_p13 = scmp.lt.u32.totalorder %s1010_s21, %s1062_s3 }
 0x2e1   : > { %p703_p6 = scmp.lt.u32.totalorder %s701_s6, %s697_s19  ;;  %p705_p12 = scmp.lt.u32.totalorder %s697_s19, %s1010_s21 }
 0x2e2   : > { %p699_p3 = pnand %p698_p7, %p900_p10 }
 0x2e3   : > { %p704_p8 = por %p703_p6, %p702_p13 }
 0x2e4   : > { %p700_p4 = pneg %p699_p3 }
 0x2e5   : > { %p706_p11 = por %p705_p12, %p704_p8 }
 0x2e7   : > { %p707_p0 = pnand %p706_p11, %p700_p4 }
 0x2e9   : > { %710 = shalt.err (!%p707_p0)
}
 0x2ea   : > { %517 = dma.vmem_to_hbm [thread:$0]  (%p900_p10), %s1012_s26, 64, %s1010_s21, %s325_s25  }
 0x2eb PF: > { %s365_s10 = sand.u32 1, %s753_s12   ;;  %p1080_p5 = scmp.ne.s32.totalorder %s1070_s23, 0 }
 0x2ec   : > { %p1081_p9 = scmp.ge.s32.totalorder %s773_s17, 2  ;;  %s366_s11 = scalar_lea.sflag [#allocation4], %s365_s10 }
 0x2ee   : > { %p529_p1 = pnand %p1081_p9, %p1080_p5 }
 0x2f0   : > { %744 = dma.done.wait (!%p529_p1), %s366_s11, 64  }
 0x2f1   : > { %746 = vsyncadd (!%p529_p1), %s366_s11, 4294967232  ;;  %s375_s29 = scalar_lea.sflag [#allocation9], %s365_s10 }
 0x2f2   : > { %748 = dma.done.wait (!%p529_p1), %s375_s29, 64  }
 0x2f3   : > { %750 = vsyncadd (!%p529_p1), %s375_s29, 4294967232  ;;  %s24_s17 = sadd.s32 1, %s773_s17   ;;  %s1082_s12 = smov %s757_s13 }
 0x2f4   : > { %p21_p2 = scmp.ge.s32.totalorder %s24_s17, 4   ;;  %s1083_s13 = smov %s761_s14 }
 0x2f5   : > { %s1084_s14 = smov %s909_s5  ;;  %s1085_s15 = smov %s769_s16 }
 0x2f6   : > { %s1086_s16 = smov %s1088_s28  ;;  %23 = sbr.rel (!%p21_p2) target bundleno = 9 (0x9), region = 94 }
 0x2fd   :  { %380 = vsyncpa [#allocation3], 1 }
 0x2fe   :  { %382 = vsyncpa [#allocation3 + $0x1], 1 }
 0x2ff   :  { %383 = vsyncpa [#allocation6], 1 }
 0x300   :  { %384 = vsyncpa [#allocation4], 1 }
 0x301   :  { %386 = vsyncpa [#allocation4 + $0x1], 1 }
 0x302   :  { %387 = vsyncpa [#allocation9], 1 }
 0x303   :  { %389 = vsyncpa [#allocation9 + $0x1], 1 }

</bundles_post_ra>
